<compile_context>
chip_gen: v5e
topology: v5e:2x2
jax: 0.10.0
libtpu: 0.0.40
codegen_flags: <defaults>
</compile_context>

<pallas_src>
import functools

import jax
import jax.numpy as jnp
from jax.experimental import pallas as pl
from jax.experimental.pallas import tpu as pltpu

_LANE = 128
_SUBLANE = 8

_ACTIVATIONS = {
    "relu": lambda y: jnp.maximum(y, 0.0),
    "tanh": jnp.tanh,
    "gelu": jax.nn.gelu,
    "sigmoid": jax.nn.sigmoid,
    "identity": lambda y: y,
}


def _round_up(x, m):
    return ((x + m - 1) // m) * m


def _linear_act_kernel(x_ref, wt_ref, b_ref, o_ref, *, act):
    # x_ref : [tm, f_c]   streamed row tile of the flattened activations
    # wt_ref: [f_c, f_c]  (resident path) or [f_c, tn] (N-panel path)
    # b_ref : [1, f_c] / [1, tn]  float32 bias (pre-cast in prepare_params)
    # o_ref : [tm, f_c] / [tm, tn]
    x = x_ref[...]
    w = wt_ref[...]
    if x.dtype != w.dtype:          # e.g. bf16 weights on v6e/v7x
        x = x.astype(w.dtype)
    y = jnp.dot(x, w, preferred_element_type=jnp.float32)
    y = y + b_ref[...]              # f32 bias: no per-step cast on the VPU
    o_ref[...] = act(y).astype(o_ref.dtype)


def prepare_params(w, b, param_dtype=None):
    """One-time parameter prep (outside the hot path): pre-transpose the
    PyTorch-layout weight (optionally cast to bf16 for v6e/v7x MXU rates) and
    store the bias as a (1, f_c) float32 row."""
    f_c = w.shape[0]
    wt = jnp.asarray(w).T
    if param_dtype is not None:
        wt = wt.astype(param_dtype)
    b2d = jnp.asarray(b, dtype=jnp.float32).reshape(1, f_c)
    return wt, b2d


def _vmem_budget_bytes():
    """~75% of this generation's physical VMEM (v5e/v6e 128 MiB, v7x 64 MiB)."""
    try:
        cap = int(pltpu.get_tpu_info().vmem_capacity_bytes)
    except Exception:
        cap = 64 * 1024 * 1024  # conservative default (v7x per-core VMEM)
    return cap * 3 // 4


def _choose_tiles(M, f_c, x_bytes, w_bytes, out_bytes, budget, weight_bufs=1):
    """Return (tm, tn, n_tiled)."""
    weight_bytes = weight_bufs * f_c * f_c * w_bytes
    # double-buffered x / out tiles + f32 matmul-result & epilogue temporaries
    per_row = f_c * (2 * x_bytes + 2 * out_bytes + 8)
    m_cap = _round_up(M, _SUBLANE)

    if weight_bytes <= budget // 2:
        # Resident-weight path: single M grid axis.
        avail = budget - weight_bytes
        tm = (avail // per_row) // _SUBLANE * _SUBLANE
        tm = max(_SUBLANE, min(tm, 1024))
        # Keep >= ~8 grid steps (4 per TC on v7x megacore) when there is enough
        # work, but never shrink below 256 rows just to manufacture steps.
        steps_cap = max(256, _round_up(pl.cdiv(M, 8), _SUBLANE))
        tm = min(tm, steps_cap, m_cap)
        return tm, f_c, False

    # Weight cannot stay fully resident: sweep (f_c, tn) column panels of the
    # weight; the x row tile is reused across the whole N sweep.
    tm = min(256, m_cap)
    while tm > _SUBLANE:
        x_tile = 2 * tm * f_c * x_bytes
        per_col = 2 * f_c * w_bytes + tm * (2 * out_bytes + 8)
        if budget - x_tile >= per_col * _LANE:
            break
        tm //= 2
    tm = max(_SUBLANE, (tm // _SUBLANE) * _SUBLANE)
    x_tile = 2 * tm * f_c * x_bytes
    per_col = 2 * f_c * w_bytes + tm * (2 * out_bytes + 8)
    tn = max(budget - x_tile, 0) // per_col // _LANE * _LANE
    tn = max(_LANE, min(tn, _round_up(f_c, _LANE)))
    # TODO(synk): add a K (contraction) grid axis for f_c so large that even a
    # single (f_c, 128) weight panel overflows the VMEM budget.
    return tm, tn, True


def _pallas_forward(x2d, wt, b2d, *, act, out_dtype, tm, tn, n_tiled,
                    vmem_limit, single_buffer_invariants):
    M, f_c = x2d.shape
    kernel = functools.partial(_linear_act_kernel, act=act)

    if not n_tiled:
        inv_kwargs = (
            dict(pipeline_mode=pl.Buffered(1)) if single_buffer_invariants else {}
        )
        grid = (pl.cdiv(M, tm),)
        in_specs = [
            pl.BlockSpec((tm, f_c), lambda i: (i, 0)),                 # streamed rows
            pl.BlockSpec((f_c, f_c), lambda i: (0, 0), **inv_kwargs),  # resident weight
            pl.BlockSpec((1, f_c), lambda i: (0, 0), **inv_kwargs),    # resident bias
        ]
        out_specs = pl.BlockSpec((tm, f_c), lambda i: (i, 0))
        dims = ("parallel",)
    else:
        grid = (pl.cdiv(M, tm), pl.cdiv(f_c, tn))
        in_specs = [
            pl.BlockSpec((tm, f_c), lambda i, j: (i, 0)),   # row tile, reused over N
            pl.BlockSpec((f_c, tn), lambda i, j: (0, j)),   # weight column panel
            pl.BlockSpec((1, tn), lambda i, j: (0, j)),     # bias panel
        ]
        out_specs = pl.BlockSpec((tm, tn), lambda i, j: (i, j))
        dims = ("parallel", "arbitrary")

    return pl.pallas_call(
        kernel,
        out_shape=jax.ShapeDtypeStruct((M, f_c), out_dtype),
        grid=grid,
        in_specs=in_specs,
        out_specs=out_specs,
        compiler_params=pltpu.CompilerParams(
            dimension_semantics=dims,
            vmem_limit_bytes=int(vmem_limit),
        ),
    )(x2d, wt, b2d)


def sequential_encoder(x, wt, b2d, activation="relu", force_pallas=False):
    """x: [B, S, f_c]; wt / b2d come from prepare_params(w, b)."""
    act = _ACTIVATIONS[activation] if isinstance(activation, str) else activation
    B, S, f_c = x.shape
    M = B * S
    x2d = x.reshape(M, f_c)

    # Small-problem fast path: a pallas_call is pure launch overhead here; let
    # XLA fuse the matmul + bias + activation with neighbouring ops instead.
    if not force_pallas and M * f_c <= (1 << 14):
        y = jnp.dot(x2d.astype(wt.dtype), wt,
                    preferred_element_type=jnp.float32) + b2d
        return act(y).astype(x.dtype).reshape(B, S, f_c)

    budget = _vmem_budget_bytes()
    x_bytes = jnp.dtype(x.dtype).itemsize
    w_bytes = jnp.dtype(wt.dtype).itemsize
    out_bytes = x_bytes

    tm, tn, n_tiled = _choose_tiles(M, f_c, x_bytes, w_bytes, out_bytes, budget)
    common = dict(act=act, out_dtype=x.dtype, vmem_limit=budget)
    try:
        out = _pallas_forward(x2d, wt, b2d, tm=tm, tn=tn, n_tiled=n_tiled,
                              single_buffer_invariants=True, **common)
    except Exception:
        # pipeline_mode=pl.Buffered(1) unsupported on this jax version: re-plan
        # with a double-buffered weight footprint and default buffering.
        tm, tn, n_tiled = _choose_tiles(M, f_c, x_bytes, w_bytes, out_bytes,
                                        budget, weight_bufs=2)
        out = _pallas_forward(x2d, wt, b2d, tm=tm, tn=tn, n_tiled=n_tiled,
                              single_buffer_invariants=False, **common)
    return out.reshape(B, S, f_c)


def _reference(x, w, b, activation="relu"):
    act = _ACTIVATIONS[activation]
    return act(jnp.einsum("bsf,gf->bsg", x, w) + b)


if __name__ == "__main__":
    key = jax.random.PRNGKey(0)
    B, S, f_c = 2, 8, 32

    kx, kw, kb = jax.random.split(key, 3)
    x = jax.random.normal(kx, (B, S, f_c), dtype=jnp.float32)
    # Deterministic "init" mimicking nn.Linear's uniform(-1/sqrt(f_c), 1/sqrt(f_c))
    bound = f_c ** -0.5
    w = jax.random.uniform(kw, (f_c, f_c), minval=-bound, maxval=bound,
                           dtype=jnp.float32)
    b = jax.random.uniform(kb, (f_c,), minval=-bound, maxval=bound,
                           dtype=jnp.float32)

    # One-time parameter prep (transpose + f32 bias) outside the hot path.
    wt, b2d = prepare_params(w, b)

    # force_pallas=True so the Pallas kernel is exercised even at this tiny
    # test size (the default path would dispatch tiny problems to fused XLA).
    y = sequential_encoder(x, wt, b2d, activation="relu", force_pallas=True)
    y = jax.block_until_ready(y)

    y_ref = _reference(x, w, b, activation="relu")
    assert y.shape == (B, S, f_c)
    assert jnp.allclose(y, y_ref, atol=1e-5, rtol=1e-5), "mismatch vs reference"

    print("KERNEL_OK")
</pallas_src>

<mosaic_0001>
module attributes {stable_mosaic.version = 11 : i64} {
  func.func @_linear_act_kernel(%arg0: i32, %arg1: memref<16x32xf32, #tpu.memory_space<vmem>>, %arg2: memref<32x32xf32, #tpu.memory_space<vmem>>, %arg3: memref<1x32xf32, #tpu.memory_space<vmem>>, %arg4: memref<16x32xf32, #tpu.memory_space<vmem>>) attributes {dimension_semantics = [#tpu.dimension_semantics<parallel>], iteration_bounds = array<i64: 1>, scalar_prefetch = 0 : i64, scratch_operands = 0 : i64, tpu.core_type = #tpu.core_type<tc>, window_params = [{transform_indices = @transform_0, window_bounds = array<i64: 16, 32>}, {pipeline_mode = #tpu.pipeline_mode<synchronous>, transform_indices = @transform_1, window_bounds = array<i64: 32, 32>}, {pipeline_mode = #tpu.pipeline_mode<synchronous>, transform_indices = @transform_2, window_bounds = array<i64: 1, 32>}, {transform_indices = @transform_3, window_bounds = array<i64: 16, 32>}]} {
    %c0 = arith.constant 0 : index
    %c0_0 = arith.constant 0 : index
    %0 = vector.load %arg1[%c0, %c0_0] : memref<16x32xf32, #tpu.memory_space<vmem>>, vector<16x32xf32>
    %c0_1 = arith.constant 0 : index
    %c0_2 = arith.constant 0 : index
    %1 = vector.load %arg2[%c0_1, %c0_2] : memref<32x32xf32, #tpu.memory_space<vmem>>, vector<32x32xf32>
    %cst = arith.constant dense<0.000000e+00> : vector<16x32xf32>
    %2 = tpu.matmul %0, %1, %cst {dimension_numbers = #tpu.dot_dimension_numbers<[1], [0], [0], [1], [0, 0, 1, 1], [], []>} : vector<16x32xf32>, vector<32x32xf32>, vector<16x32xf32> -> vector<16x32xf32>
    %c0_3 = arith.constant 0 : index
    %c0_4 = arith.constant 0 : index
    %3 = vector.load %arg3[%c0_3, %c0_4] : memref<1x32xf32, #tpu.memory_space<vmem>>, vector<1x32xf32>
    %4 = vector.broadcast %3 : vector<1x32xf32> to vector<16x32xf32>
    %5 = arith.addf %2, %4 : vector<16x32xf32>
    %cst_5 = arith.constant 0.000000e+00 : f32
    %6 = vector.broadcast %cst_5 : f32 to vector<16x32xf32>
    %7 = arith.maximumf %5, %6 : vector<16x32xf32>
    %c0_6 = arith.constant 0 : index
    %c0_7 = arith.constant 0 : index
    %8 = vector.load %arg4[%c0_6, %c0_7] : memref<16x32xf32, #tpu.memory_space<vmem>>, vector<16x32xf32>
    tpu.vector_store %arg4[%c0_6, %c0_7], %7 {strides = array<i32>} : memref<16x32xf32, #tpu.memory_space<vmem>>, vector<16x32xf32>,
    return
  }
  func.func @transform_0(%arg0: i32) -> (i32, i32) {
    %c0_i32 = arith.constant 0 : i32
    %c0_i32_0 = arith.constant 0 : i32
    return %arg0, %c0_i32 : i32, i32
  }
  func.func @transform_1(%arg0: i32) -> (i32, i32) {
    %c0_i32 = arith.constant 0 : i32
    %c0_i32_0 = arith.constant 0 : i32
    %c0_i32_1 = arith.constant 0 : i32
    return %c0_i32, %c0_i32_0 : i32, i32
  }
  func.func @transform_2(%arg0: i32) -> (i32, i32) {
    %c0_i32 = arith.constant 0 : i32
    %c0_i32_0 = arith.constant 0 : i32
    %c0_i32_1 = arith.constant 0 : i32
    return %c0_i32, %c0_i32_0 : i32, i32
  }
  func.func @transform_3(%arg0: i32) -> (i32, i32) {
    %c0_i32 = arith.constant 0 : i32
    %c0_i32_0 = arith.constant 0 : i32
    return %arg0, %c0_i32 : i32, i32
  }
}

module attributes {stable_mosaic.version = 11 : i64} {
  func.func @_linear_act_kernel(%arg0: i32, %arg1: memref<16x32xf32, #tpu.memory_space<vmem>>, %arg2: memref<32x32xf32, #tpu.memory_space<vmem>>, %arg3: memref<1x32xf32, #tpu.memory_space<vmem>>, %arg4: memref<16x32xf32, #tpu.memory_space<vmem>>) attributes {dimension_semantics = [#tpu.dimension_semantics<parallel>], iteration_bounds = array<i64: 1>, scalar_prefetch = 0 : i64, scratch_operands = 0 : i64, tpu.core_type = #tpu.core_type<tc>, window_params = [{transform_indices = @transform_0, window_bounds = array<i64: 16, 32>}, {pipeline_mode = #tpu.pipeline_mode<synchronous>, transform_indices = @transform_1, window_bounds = array<i64: 32, 32>}, {pipeline_mode = #tpu.pipeline_mode<synchronous>, transform_indices = @transform_2, window_bounds = array<i64: 1, 32>}, {transform_indices = @transform_3, window_bounds = array<i64: 16, 32>}]} {
    %c0 = arith.constant 0 : index
    %c0_0 = arith.constant 0 : index
    %0 = vector.load %arg1[%c0, %c0_0] : memref<16x32xf32, #tpu.memory_space<vmem>>, vector<16x32xf32>
    %c0_1 = arith.constant 0 : index
    %c0_2 = arith.constant 0 : index
    %1 = vector.load %arg2[%c0_1, %c0_2] : memref<32x32xf32, #tpu.memory_space<vmem>>, vector<32x32xf32>
    %cst = arith.constant dense<0.000000e+00> : vector<16x32xf32>
    %2 = tpu.matmul %0, %1, %cst {dimension_numbers = #tpu.dot_dimension_numbers<[1], [0], [0], [1], [0, 0, 1, 1], [], []>} : vector<16x32xf32>, vector<32x32xf32>, vector<16x32xf32> -> vector<16x32xf32>
    %c0_3 = arith.constant 0 : index
    %c0_4 = arith.constant 0 : index
    %3 = vector.load %arg3[%c0_3, %c0_4] : memref<1x32xf32, #tpu.memory_space<vmem>>, vector<1x32xf32>
    %4 = vector.broadcast %3 : vector<1x32xf32> to vector<16x32xf32>
    %5 = arith.addf %2, %4 : vector<16x32xf32>
    %cst_5 = arith.constant 0.000000e+00 : f32
    %6 = vector.broadcast %cst_5 : f32 to vector<16x32xf32>
    %7 = arith.maximumf %5, %6 : vector<16x32xf32>
    %c0_6 = arith.constant 0 : index
    %c0_7 = arith.constant 0 : index
    %8 = vector.load %arg4[%c0_6, %c0_7] : memref<16x32xf32, #tpu.memory_space<vmem>>, vector<16x32xf32>
    tpu.vector_store %arg4[%c0_6, %c0_7], %7 {strides = array<i32>} : memref<16x32xf32, #tpu.memory_space<vmem>>, vector<16x32xf32>,
    return
  }
  func.func @transform_0(%arg0: i32) -> (i32, i32) {
    %c0_i32 = arith.constant 0 : i32
    %c0_i32_0 = arith.constant 0 : i32
    return %arg0, %c0_i32 : i32, i32
  }
  func.func @transform_1(%arg0: i32) -> (i32, i32) {
    %c0_i32 = arith.constant 0 : i32
    %c0_i32_0 = arith.constant 0 : i32
    %c0_i32_1 = arith.constant 0 : i32
    return %c0_i32, %c0_i32_0 : i32, i32
  }
  func.func @transform_2(%arg0: i32) -> (i32, i32) {
    %c0_i32 = arith.constant 0 : i32
    %c0_i32_0 = arith.constant 0 : i32
    %c0_i32_1 = arith.constant 0 : i32
    return %c0_i32, %c0_i32_0 : i32, i32
  }
  func.func @transform_3(%arg0: i32) -> (i32, i32) {
    %c0_i32 = arith.constant 0 : i32
    %c0_i32_0 = arith.constant 0 : i32
    return %arg0, %c0_i32 : i32, i32
  }
}

</mosaic_0001>

<bundles_post_ra>
// kernel: tpu_custom_call.1
= control target key start
LH: loop header
LB: loop body
LE: loop exit
PB: predicated region body
PF: predicated region fallthrough
CT: control target
= control target key end

     0   :  { %8 = vsyncpa [#allocation3], 0  ;;  %s251_s0 = inlined_call_operand.hbm [shape: f32[16,32], index: 0, kind: input, shape index: {}]   ;;  %s252_s1 = inlined_call_operand.hbm [shape: f32[32,32], index: 1, kind: input, shape index: {}]   ;;  %s253_s2 = inlined_call_operand.vmem [shape: f32[1,32], index: 2, kind: input, shape index: {}]   ;;  %s254_s3 = inlined_call_operand.hbm [shape: f32[16,32], index: 3, kind: output, shape index: {}]  }
   0x1   :  { %9 = vsyncpa [#allocation6], 0 }
   0x2   :  { %10 = vsyncpa [#allocation4], 0  ;;  %s15_s14 = sshll.u32 %s251_s0, 4  ;;  %s201_s15 = smov [#allocation2]   ;;  %s16_s14 = int_to_ptr.hbm [resolvable:$true] %s15_s14 }
   0x3   :  { %s17_s16 = sshll.u32 %s201_s15, 4  ;;  %s28_s19 = sshll.u32 %s252_s1, 4  ;;  %s18_s16 = int_to_ptr.vmem [resolvable:$true] %s17_s16  ;;  %s29_s19 = int_to_ptr.hbm [resolvable:$true] %s28_s19 }
   0x4   :  { %s202_s20 = smov 128   ;;  %s203_s21 = smov 8  }
   0x5   :  { %23 = dma.hbm_to_vmem [thread:$0]  %s16_s14, 256, %s18_s16, [#allocation3], %s202_s20, %s202_s20, %s203_s21  }
   0x6   :  { %s204_s22 = smov [#allocation5]  }
   0x7   :  { %s30_s23 = sshll.u32 %s204_s22, 4  ;;  %s31_s23 = int_to_ptr.vmem [resolvable:$true] %s30_s23 }
   0x8   :  { %36 = dma.hbm_to_vmem [thread:$0]  %s29_s19, 512, %s31_s23, [#allocation6], %s202_s20, %s202_s20, %s203_s21  }
   0x9   :  { %195 = dma.done.wait [#allocation3], 256  }
   0xa   :  { %196 = vsyncadd [#allocation3], 4294967040 }
   0xb   :  { %197 = dma.done.wait [#allocation6], 512  }
   0xc   :  { %198 = vsyncadd [#allocation6], 4294966784  ;;  %v52_v0 = vld [vmem:[#allocation5 + $0x18] sm:$0xff]  ;;  %v51_v1 = vld [vmem:[#allocation5 + $0x10] sm:$0xff]  ;;  %vm57_vm0 = vcmask 261120   ;;  %s205_s24 = smov [#allocation7]  }
   0xd   :  { %76 = vmatpush.msra.mxu0 %v52_v0  ;;  %113 = vmatpush.msra.mxu1 %v52_v0  ;;  %v50_v2 = vld [vmem:[#allocation5 + $0x8] sm:$0xff]  ;;  %v49_v3 = vld [vmem:[#allocation5] sm:$0xff]  ;;  %v47_v4 = vld [vmem:[#allocation2] sm:$0xff]  ;;  %s95_s25 = sshll.u32 %s205_s24, 4  ;;  %s97_s28 = sshll.u32 %s254_s3, 4  ;;  %s96_s25 = int_to_ptr.vmem [resolvable:$true] %s95_s25  ;;  %s98_s28 = int_to_ptr.hbm [resolvable:$true] %s97_s28 }
   0xe   :  { %v48_v5 = vld [vmem:[#allocation2 + $0x8] sm:$0xff]  ;;  %v122_v6 = vld [vmem:[%s253_s2] ss:$0 sm:$0xff] }
   0xf   :  { %77 = vmatpush.msra.mxu0 %v51_v1  ;;  %114 = vmatpush.msra.mxu1 %v51_v1 }
  0x11   :  { %78 = vmatpush.msra.mxu0 %v50_v2  ;;  %115 = vmatpush.msra.mxu1 %v50_v2 }
  0x13   :  { %79 = vmatpush.msra.mxu0 %v49_v3  ;;  %116 = vmatpush.msra.mxu1 %v49_v3 }
  0x14   :  { %111 = vmatmul.msk.f32.vlgmr.msra.gmra.mxu0 %vm57_vm0, %v47_v4  ;;  %112 = vmatmul.msk.f32.vlgmr.msra.gmra.mxu1 %vm57_vm0, %v48_v5 }
  0x91   :  { %v81_v7 = vpop.f32.mrf.mxu0  ;;  %v84_v8 = vpop.f32.mrf.mxu1 }
  0x92   :  { %v82_v9 = vadd.f32 %v122_v6, %v81_v7  ;;  %v85_v10 = vadd.f32 %v122_v6, %v84_v8 }
  0x94   :  { %v87_v11 = vmax.f32 %v82_v9, 0.0  ;;  %v88_v12 = vmax.f32 %v85_v10, 0.0 }
  0x96   :  { %89 = vst.msk [vmem:[#allocation7] sm:$0xff] %vm57_vm0, %v87_v11 }
  0x97   :  { %90 = vst.msk [vmem:[#allocation7 + $0x8] sm:$0xff] %vm57_vm0, %v88_v12 }
  0x98   :  { %103 = dma.vmem_to_hbm [thread:$0]  %s96_s25, 256, %s98_s28, [#allocation4], %s202_s20, %s202_s20, %s203_s21  }
  0x99   :  { %199 = dma.done.wait [#allocation4], 256  }
  0x9a   :  { %200 = vsyncadd [#allocation4], 4294967040 }
  0x9b   :  { %108 = vsyncpa [#allocation3], 1 }
  0x9c   :  { %109 = vsyncpa [#allocation6], 1 }
  0x9d   :  { %110 = vsyncpa [#allocation4], 1 }

// kernel: tpu_custom_call.1
= control target key start
LH: loop header
LB: loop body
LE: loop exit
PB: predicated region body
PF: predicated region fallthrough
CT: control target
= control target key end

     0   :  { %8 = vsyncpa [#allocation3], 0  ;;  %s251_s0 = inlined_call_operand.hbm [shape: f32[16,32], index: 0, kind: input, shape index: {}]   ;;  %s252_s1 = inlined_call_operand.hbm [shape: f32[32,32], index: 1, kind: input, shape index: {}]   ;;  %s253_s2 = inlined_call_operand.vmem [shape: f32[1,32], index: 2, kind: input, shape index: {}]   ;;  %s254_s3 = inlined_call_operand.hbm [shape: f32[16,32], index: 3, kind: output, shape index: {}]  }
   0x1   :  { %9 = vsyncpa [#allocation6], 0 }
   0x2   :  { %10 = vsyncpa [#allocation4], 0  ;;  %s15_s14 = sshll.u32 %s251_s0, 4  ;;  %s201_s15 = smov [#allocation2]   ;;  %s16_s14 = int_to_ptr.hbm [resolvable:$true] %s15_s14 }
   0x3   :  { %s17_s16 = sshll.u32 %s201_s15, 4  ;;  %s28_s19 = sshll.u32 %s252_s1, 4  ;;  %s18_s16 = int_to_ptr.vmem [resolvable:$true] %s17_s16  ;;  %s29_s19 = int_to_ptr.hbm [resolvable:$true] %s28_s19 }
   0x4   :  { %s202_s20 = smov 128   ;;  %s203_s21 = smov 8  }
   0x5   :  { %23 = dma.hbm_to_vmem [thread:$0]  %s16_s14, 256, %s18_s16, [#allocation3], %s202_s20, %s202_s20, %s203_s21  }
   0x6   :  { %s204_s22 = smov [#allocation5]  }
   0x7   :  { %s30_s23 = sshll.u32 %s204_s22, 4  ;;  %s31_s23 = int_to_ptr.vmem [resolvable:$true] %s30_s23 }
   0x8   :  { %36 = dma.hbm_to_vmem [thread:$0]  %s29_s19, 512, %s31_s23, [#allocation6], %s202_s20, %s202_s20, %s203_s21  }
   0x9   :  { %195 = dma.done.wait [#allocation3], 256  }
   0xa   :  { %196 = vsyncadd [#allocation3], 4294967040 }
   0xb   :  { %197 = dma.done.wait [#allocation6], 512  }
   0xc   :  { %198 = vsyncadd [#allocation6], 4294966784  ;;  %v52_v0 = vld [vmem:[#allocation5 + $0x18] sm:$0xff]  ;;  %v51_v1 = vld [vmem:[#allocation5 + $0x10] sm:$0xff]  ;;  %vm57_vm0 = vcmask 261120   ;;  %s205_s24 = smov [#allocation7]  }
   0xd   :  { %76 = vmatpush.msra.mxu0 %v52_v0  ;;  %113 = vmatpush.msra.mxu1 %v52_v0  ;;  %v50_v2 = vld [vmem:[#allocation5 + $0x8] sm:$0xff]  ;;  %v49_v3 = vld [vmem:[#allocation5] sm:$0xff]  ;;  %v47_v4 = vld [vmem:[#allocation2] sm:$0xff]  ;;  %s95_s25 = sshll.u32 %s205_s24, 4  ;;  %s97_s28 = sshll.u32 %s254_s3, 4  ;;  %s96_s25 = int_to_ptr.vmem [resolvable:$true] %s95_s25  ;;  %s98_s28 = int_to_ptr.hbm [resolvable:$true] %s97_s28 }
   0xe   :  { %v48_v5 = vld [vmem:[#allocation2 + $0x8] sm:$0xff]  ;;  %v122_v6 = vld [vmem:[%s253_s2] ss:$0 sm:$0xff] }
   0xf   :  { %77 = vmatpush.msra.mxu0 %v51_v1  ;;  %114 = vmatpush.msra.mxu1 %v51_v1 }
  0x11   :  { %78 = vmatpush.msra.mxu0 %v50_v2  ;;  %115 = vmatpush.msra.mxu1 %v50_v2 }
  0x13   :  { %79 = vmatpush.msra.mxu0 %v49_v3  ;;  %116 = vmatpush.msra.mxu1 %v49_v3 }
  0x14   :  { %111 = vmatmul.msk.f32.vlgmr.msra.gmra.mxu0 %vm57_vm0, %v47_v4  ;;  %112 = vmatmul.msk.f32.vlgmr.msra.gmra.mxu1 %vm57_vm0, %v48_v5 }
  0x91   :  { %v81_v7 = vpop.f32.mrf.mxu0  ;;  %v84_v8 = vpop.f32.mrf.mxu1 }
  0x92   :  { %v82_v9 = vadd.f32 %v122_v6, %v81_v7  ;;  %v85_v10 = vadd.f32 %v122_v6, %v84_v8 }
  0x94   :  { %v87_v11 = vmax.f32 %v82_v9, 0.0  ;;  %v88_v12 = vmax.f32 %v85_v10, 0.0 }
  0x96   :  { %89 = vst.msk [vmem:[#allocation7] sm:$0xff] %vm57_vm0, %v87_v11 }
  0x97   :  { %90 = vst.msk [vmem:[#allocation7 + $0x8] sm:$0xff] %vm57_vm0, %v88_v12 }
  0x98   :  { %103 = dma.vmem_to_hbm [thread:$0]  %s96_s25, 256, %s98_s28, [#allocation4], %s202_s20, %s202_s20, %s203_s21  }
  0x99   :  { %199 = dma.done.wait [#allocation4], 256  }
  0x9a   :  { %200 = vsyncadd [#allocation4], 4294967040 }
  0x9b   :  { %108 = vsyncpa [#allocation3], 1 }
  0x9c   :  { %109 = vsyncpa [#allocation6], 1 }
  0x9d   :  { %110 = vsyncpa [#allocation4], 1 }

</bundles_post_ra>
